<compile_context>
chip_gen: v7x
topology: tpu7x:2x2x1
jax: 0.10.0
libtpu: 0.0.40
codegen_flags: <defaults>
</compile_context>

<pallas_src>
import jax
import jax.numpy as jnp
import numpy as np
from jax.experimental import pallas as pl
from jax.experimental.pallas import tpu as pltpu


N_UNITS_HIDDEN1 = 256        # linear1 hidden width
N_UNITS_HIDDEN2 = 128        # linear2 / linear3 hidden width
IN_PAD = 128                 # x padded to a full lane tile
SLAB_WIDTH = 128             # lane-dense packed output slab


def _round_up(x, m):
    return (x + m - 1) // m * m


# ----------------------------------------------------------------------------
# Kernel: one fused decoder step (2-layer GRU cell + 3 output heads, 4 GEMMs).
# ----------------------------------------------------------------------------
def _decoder_step_kernel(
    x_ref, h_ref,                       # activations (x bf16, h f32)
    w1_ref, w2_ref, w2a_ref, w3_ref,    # bf16 fused weights
    b_ref,                              # one fused f32 bias row
    h_out_ref, slab_ref,                # outputs (h_out aliased with h_ref)
):
    H = h_ref.shape[-1]
    G = 4 * H                                   # fused gate width per layer
    N1 = N_UNITS_HIDDEN1
    N2 = N_UNITS_HIDDEN2
    # static bias offsets inside the fused bias row
    o_b2 = G
    o_b2a = o_b2 + G + N1 + N2
    o_b3 = o_b2a + N2

    b1 = b_ref[:, 0:G]
    b2 = b_ref[:, o_b2:o_b2 + G + N1 + N2]
    b2a = b_ref[:, o_b2a:o_b2a + N2]
    b3 = b_ref[:, o_b3:o_b3 + SLAB_WIDTH]

    h0 = h_ref[0]                               # (B, H) f32
    h1 = h_ref[1]                               # (B, H) f32

    # ---- Layer 1: single fused GEMM  [x_pad | h0] @ W1 -> [r | z | gi_n | gh_n]
    xh = jnp.concatenate([x_ref[...], h0.astype(jnp.bfloat16)], axis=-1)
    g1 = jnp.dot(xh, w1_ref[...], preferred_element_type=jnp.float32) + b1
    r1 = jax.nn.sigmoid(g1[:, 0:H])
    z1 = jax.nn.sigmoid(g1[:, H:2 * H])
    n1 = jnp.tanh(g1[:, 2 * H:3 * H] + r1 * g1[:, 3 * H:4 * H])
    h0_new = (1.0 - z1) * n1 + z1 * h0
    h0_bf = h0_new.astype(jnp.bfloat16)         # cast once, reused below

    # ---- Layer 2: fused GEMM also carries the h0_new-only head columns
    #      [h0_new | h1_old] @ W2 -> [r | z | gi_n | gh_n | lin1a(256) | lin3a(128)]
    hh = jnp.concatenate([h0_bf, h1.astype(jnp.bfloat16)], axis=-1)
    g2 = jnp.dot(hh, w2_ref[...], preferred_element_type=jnp.float32) + b2
    r2 = jax.nn.sigmoid(g2[:, 0:H])
    z2 = jax.nn.sigmoid(g2[:, H:2 * H])
    n2 = jnp.tanh(g2[:, 2 * H:3 * H] + r2 * g2[:, 3 * H:4 * H])
    h1_new = (1.0 - z2) * n2 + z2 * h1

    h_out_ref[0] = h0_new                       # in-place hidden update
    h_out_ref[1] = h1_new

    t1 = g2[:, G:G + N1]                        # linear1a; LeakyReLU(1.0) = id
    t3 = jnp.maximum(g2[:, G + N1:G + N1 + N2], 0.0)   # linear3a + ReLU

    # ---- linear2a (the only head stage that needs h1_new)
    t2 = jnp.maximum(
        jnp.dot(h1_new.astype(jnp.bfloat16), w2a_ref[...],
                preferred_element_type=jnp.float32) + b2a, 0.0)

    # ---- Stage 2: one fused block-diagonal head GEMM into the lane-dense slab
    #      [output_code | output_param | stop_sign | zero pad]   (B, 128)
    t = jnp.concatenate([t1, t2, t3], axis=-1).astype(jnp.bfloat16)
    slab_ref[...] = jnp.dot(t, w3_ref[...],
                            preferred_element_type=jnp.float32) + b3


# ----------------------------------------------------------------------------
# Parameter construction (PyTorch layout) and fused-weight preparation.
# ----------------------------------------------------------------------------
def init_decoder_params(key, input_size, hidden_size):
    """PyTorch-layout f32 parameters (weights are (out_features, in_features))."""
    H, I = hidden_size, input_size
    code = I - 6
    N1, N2 = N_UNITS_HIDDEN1, N_UNITS_HIDDEN2

    def uni(k, shape, fan_in):
        bound = 1.0 / np.sqrt(fan_in)
        return jax.random.uniform(k, shape, jnp.float32, -bound, bound)

    keys = iter(jax.random.split(key, 24))
    p = {}
    # GRU layer 0 / layer 1 (stacked gate order r, z, n as in PyTorch).
    p["w_ih_l0"] = uni(next(keys), (3 * H, I), H)
    p["w_hh_l0"] = uni(next(keys), (3 * H, H), H)
    p["b_ih_l0"] = uni(next(keys), (3 * H,), H)
    p["b_hh_l0"] = uni(next(keys), (3 * H,), H)
    p["w_ih_l1"] = uni(next(keys), (3 * H, H), H)
    p["w_hh_l1"] = uni(next(keys), (3 * H, H), H)
    p["b_ih_l1"] = uni(next(keys), (3 * H,), H)
    p["b_hh_l1"] = uni(next(keys), (3 * H,), H)
    # linear1: H -> 256 -> (input_size - 6)
    p["w1a"] = uni(next(keys), (N1, H), H)
    p["b1a"] = uni(next(keys), (N1,), H)
    p["w1b"] = uni(next(keys), (code, N1), N1)
    p["b1b"] = uni(next(keys), (code,), N1)
    # linear2: H -> 128 -> 6
    p["w2a"] = uni(next(keys), (N2, H), H)
    p["b2a"] = uni(next(keys), (N2,), H)
    p["w2b"] = uni(next(keys), (6, N2), N2)
    p["b2b"] = uni(next(keys), (6,), N2)
    # linear3: H -> 128 -> 1
    p["w3a"] = uni(next(keys), (N2, H), H)
    p["b3a"] = uni(next(keys), (N2,), H)
    p["w3b"] = uni(next(keys), (1, N2), N2)
    p["b3b"] = uni(next(keys), (1,), N2)
    return p


def prepare_decoder_params(p, input_size, hidden_size):
    """Build the 4 fused bf16 weight matrices + one fused f32 bias row.
    Done once, outside the kernel."""
    H, I = hidden_size, input_size
    code = I - 6
    N1, N2 = N_UNITS_HIDDEN1, N_UNITS_HIDDEN2
    assert code + 7 <= SLAB_WIDTH, "input_size + 1 must fit in the 128-lane slab"
    assert I <= IN_PAD

    def to_np(a):
        return np.asarray(a, np.float32)

    wih0, whh0 = to_np(p["w_ih_l0"]), to_np(p["w_hh_l0"])
    bih0, bhh0 = to_np(p["b_ih_l0"]), to_np(p["b_hh_l0"])
    wih1, whh1 = to_np(p["w_ih_l1"]), to_np(p["w_hh_l1"])
    bih1, bhh1 = to_np(p["b_ih_l1"]), to_np(p["b_hh_l1"])

    # ---- Layer-1 fused GEMM: [x_pad | h0] (K=IN_PAD+H) -> [r | z | gi_n | gh_n]
    W1 = np.zeros((IN_PAD + H, 4 * H), np.float32)
    W1[:I, 0:H] = wih0[0:H].T
    W1[:I, H:2 * H] = wih0[H:2 * H].T
    W1[:I, 2 * H:3 * H] = wih0[2 * H:3 * H].T
    W1[IN_PAD:, 0:H] = whh0[0:H].T
    W1[IN_PAD:, H:2 * H] = whh0[H:2 * H].T
    W1[IN_PAD:, 3 * H:4 * H] = whh0[2 * H:3 * H].T
    # r / z biases merge; n-gate biases stay split (b_hh_n must sit inside r*(...)).
    b1 = np.concatenate([bih0[0:H] + bhh0[0:H], bih0[H:2 * H] + bhh0[H:2 * H],
                         bih0[2 * H:3 * H], bhh0[2 * H:3 * H]])

    # ---- Layer-2 fused GEMM + h0_new-only head columns:
    #      [h0_new | h1_old] (K=2H) -> [r | z | gi_n | gh_n | lin1a | lin3a]
    G = 4 * H
    W2 = np.zeros((2 * H, G + N1 + N2), np.float32)
    W2[:H, 0:H] = wih1[0:H].T
    W2[:H, H:2 * H] = wih1[H:2 * H].T
    W2[:H, 2 * H:3 * H] = wih1[2 * H:3 * H].T
    W2[H:, 0:H] = whh1[0:H].T
    W2[H:, H:2 * H] = whh1[H:2 * H].T
    W2[H:, 3 * H:4 * H] = whh1[2 * H:3 * H].T
    W2[:H, G:G + N1] = to_np(p["w1a"]).T            # linear1a <- h0_new
    W2[:H, G + N1:] = to_np(p["w3a"]).T             # linear3a <- h0_new
    b2 = np.concatenate([bih1[0:H] + bhh1[0:H], bih1[H:2 * H] + bhh1[H:2 * H],
                         bih1[2 * H:3 * H], bhh1[2 * H:3 * H],
                         to_np(p["b1a"]), to_np(p["b3a"])])

    # ---- linear2a (needs h1_new)
    W2a = to_np(p["w2a"]).T                         # (H, N2)
    b2a = to_np(p["b2a"])

    # ---- Stage-2 fused head GEMM: [t1 | t2 | t3] -> [code | param | stop | 0]
    W3 = np.zeros((N1 + 2 * N2, SLAB_WIDTH), np.float32)
    W3[:N1, :code] = to_np(p["w1b"]).T
    W3[N1:N1 + N2, code:code + 6] = to_np(p["w2b"]).T
    W3[N1 + N2:, code + 6:code + 7] = to_np(p["w3b"]).T
    b3 = np.zeros((SLAB_WIDTH,), np.float32)
    b3[:code] = to_np(p["b1b"])
    b3[code:code + 6] = to_np(p["b2b"])
    b3[code + 6] = to_np(p["b3b"])[0]

    # ---- one fused, lane-aligned bias row (512 | 896 | 128 | 128 = 1664)
    biases = np.concatenate([b1, b2, b2a, b3])[None, :]

    return {
        "W1": jnp.asarray(W1, jnp.bfloat16),
        "W2": jnp.asarray(W2, jnp.bfloat16),
        "W2a": jnp.asarray(W2a, jnp.bfloat16),
        "W3": jnp.asarray(W3, jnp.bfloat16),
        "biases": jnp.asarray(biases, jnp.float32),
    }


# ----------------------------------------------------------------------------
# Forward wrapper.
# ----------------------------------------------------------------------------
@jax.jit
def decoder_rnn_forward(q, inp, hidden):
    """inp: (1, B, input_size); hidden: (2, B, hidden_size)."""
    _, B, I = inp.shape
    H = hidden.shape[-1]
    B_pad = _round_up(max(B, 1), 8)     # sublane-pad the batch

    # x padded to a full 128-lane tile (matching W1 rows are zero), bf16 once.
    x = jnp.zeros((B_pad, IN_PAD), jnp.bfloat16)
    x = x.at[:B, :I].set(inp[0].astype(jnp.bfloat16))
    h = jnp.pad(hidden, ((0, 0), (0, B_pad - B), (0, 0)))

    h_new, slab = pl.pallas_call(
        _decoder_step_kernel,
        out_shape=(
            jax.ShapeDtypeStruct((2, B_pad, H), jnp.float32),        # new hidden
            jax.ShapeDtypeStruct((B_pad, SLAB_WIDTH), jnp.float32),  # packed slab
        ),
        in_specs=[pl.BlockSpec(memory_space=pltpu.MemorySpace.VMEM)] * 7,
        out_specs=(pl.BlockSpec(memory_space=pltpu.MemorySpace.VMEM),) * 2,
        input_output_aliases={1: 0},    # hidden state updated in place
        compiler_params=pltpu.CompilerParams(
            vmem_limit_bytes=4 * 1024 * 1024),
    )(x, h, q["W1"], q["W2"], q["W2a"], q["W3"], q["biases"])

    h_new = h_new[:, :B]
    output = h_new[1][None]             # (1, B, H): top-layer GRU output
    output_seq = slab[:B, :I]           # [output_code | output_param]
    stop_sign = slab[:B, I:I + 1]       # (B, 1)
    return output, h_new, output_seq, stop_sign


# ----------------------------------------------------------------------------
# Pure-JAX f32 reference (eval-mode PyTorch semantics) for validation.
# ----------------------------------------------------------------------------
def decoder_rnn_reference(p, inp, hidden):
    x = inp[0]
    H = hidden.shape[-1]

    def gru_cell(x, h, w_ih, w_hh, b_ih, b_hh):
        gi = x @ w_ih.T + b_ih
        gh = h @ w_hh.T + b_hh
        r = jax.nn.sigmoid(gi[:, :H] + gh[:, :H])
        z = jax.nn.sigmoid(gi[:, H:2 * H] + gh[:, H:2 * H])
        n = jnp.tanh(gi[:, 2 * H:] + r * gh[:, 2 * H:])
        return (1.0 - z) * n + z * h

    h0 = gru_cell(x, hidden[0], p["w_ih_l0"], p["w_hh_l0"],
                  p["b_ih_l0"], p["b_hh_l0"])
    h1 = gru_cell(h0, hidden[1], p["w_ih_l1"], p["w_hh_l1"],
                  p["b_ih_l1"], p["b_hh_l1"])

    t1 = h0 @ p["w1a"].T + p["b1a"]              # LeakyReLU(slope=1.0) == id
    code = t1 @ p["w1b"].T + p["b1b"]
    t2 = jnp.maximum(h1 @ p["w2a"].T + p["b2a"], 0.0)
    param = t2 @ p["w2b"].T + p["b2b"]
    t3 = jnp.maximum(h0 @ p["w3a"].T + p["b3a"], 0.0)
    stop = t3 @ p["w3b"].T + p["b3b"]

    output = h1[None]
    new_hidden = jnp.stack([h0, h1])
    output_seq = jnp.concatenate([code, param], axis=1)
    return output, new_hidden, output_seq, stop


if __name__ == "__main__":
    key = jax.random.PRNGKey(0)
    B = 4
    INPUT_SIZE = 22      # output_code size = 16, output_param size = 6
    HIDDEN_SIZE = 128

    kp, ki, kh = jax.random.split(key, 3)
    params = init_decoder_params(kp, INPUT_SIZE, HIDDEN_SIZE)
    prepped = prepare_decoder_params(params, INPUT_SIZE, HIDDEN_SIZE)

    inp = 0.25 * jax.random.normal(ki, (1, B, INPUT_SIZE), jnp.float32)
    hid = 0.25 * jax.random.normal(kh, (2, B, HIDDEN_SIZE), jnp.float32)

    outs = decoder_rnn_forward(prepped, inp, hid)
    outs = jax.block_until_ready(outs)

    refs = decoder_rnn_reference(params, inp, hid)
    names = ("output", "hidden", "output_seq", "stop_sign")
    for name, got, ref in zip(names, outs, refs):
        np.testing.assert_allclose(
            np.asarray(got), np.asarray(ref), rtol=5e-2, atol=5e-2,
            err_msg=f"mismatch in {name}")

    print("KERNEL_OK")
</pallas_src>

<mosaic_0001>
module attributes {stable_mosaic.version = 11 : i64} {
  func.func @_decoder_step_kernel(%arg0: memref<8x128xbf16, #tpu.memory_space<vmem>>, %arg1: memref<2x8x128xf32, #tpu.memory_space<vmem>>, %arg2: memref<256x512xbf16, #tpu.memory_space<vmem>>, %arg3: memref<256x896xbf16, #tpu.memory_space<vmem>>, %arg4: memref<128x128xbf16, #tpu.memory_space<vmem>>, %arg5: memref<512x128xbf16, #tpu.memory_space<vmem>>, %arg6: memref<1x1664xf32, #tpu.memory_space<vmem>>, %arg7: memref<2x8x128xf32, #tpu.memory_space<vmem>>, %arg8: memref<8x128xf32, #tpu.memory_space<vmem>>) attributes {dimension_semantics = [], scalar_prefetch = 0 : i64, scratch_operands = 0 : i64, tpu.core_type = #tpu.core_type<tc>} {
    %c0 = arith.constant 0 : index
    %c0_0 = arith.constant 0 : index
    %0 = vector.load %arg6[%c0, %c0_0] : memref<1x1664xf32, #tpu.memory_space<vmem>>, vector<1x512xf32>
    %c0_1 = arith.constant 0 : index
    %c512 = arith.constant 512 : index
    %1 = vector.load %arg6[%c0_1, %c512] : memref<1x1664xf32, #tpu.memory_space<vmem>>, vector<1x896xf32>
    %c0_2 = arith.constant 0 : index
    %c1408 = arith.constant 1408 : index
    %2 = vector.load %arg6[%c0_2, %c1408] : memref<1x1664xf32, #tpu.memory_space<vmem>>, vector<1x128xf32>
    %c0_3 = arith.constant 0 : index
    %c1536 = arith.constant 1536 : index
    %3 = vector.load %arg6[%c0_3, %c1536] : memref<1x1664xf32, #tpu.memory_space<vmem>>, vector<1x128xf32>
    %c0_4 = arith.constant 0 : index
    %c0_5 = arith.constant 0 : index
    %c0_6 = arith.constant 0 : index
    %4 = vector.load %arg1[%c0_4, %c0_5, %c0_6] : memref<2x8x128xf32, #tpu.memory_space<vmem>>, vector<1x8x128xf32>
    %5 = vector.shape_cast %4 : vector<1x8x128xf32> to vector<8x128xf32>
    %c1 = arith.constant 1 : index
    %c0_7 = arith.constant 0 : index
    %c0_8 = arith.constant 0 : index
    %6 = vector.load %arg1[%c1, %c0_7, %c0_8] : memref<2x8x128xf32, #tpu.memory_space<vmem>>, vector<1x8x128xf32>
    %7 = vector.shape_cast %6 : vector<1x8x128xf32> to vector<8x128xf32>
    %c0_9 = arith.constant 0 : index
    %c0_10 = arith.constant 0 : index
    %8 = vector.load %arg0[%c0_9, %c0_10] : memref<8x128xbf16, #tpu.memory_space<vmem>>, vector<8x128xbf16>
    %9 = arith.truncf %5 : vector<8x128xf32> to vector<8x128xbf16>
    %10 = tpu.concatenate %8, %9 in 1 : vector<8x128xbf16>, vector<8x128xbf16> -> vector<8x256xbf16>
    %c0_11 = arith.constant 0 : index
    %c0_12 = arith.constant 0 : index
    %11 = vector.load %arg2[%c0_11, %c0_12] : memref<256x512xbf16, #tpu.memory_space<vmem>>, vector<256x512xbf16>
    %cst = arith.constant dense<0.000000e+00> : vector<8x512xf32>
    %12 = tpu.matmul %10, %11, %cst {dimension_numbers = #tpu.dot_dimension_numbers<[1], [0], [0], [1], [0, 0, 1, 1], [], []>} : vector<8x256xbf16>, vector<256x512xbf16>, vector<8x512xf32> -> vector<8x512xf32>
    %13 = vector.broadcast %0 : vector<1x512xf32> to vector<8x512xf32>
    %14 = arith.addf %12, %13 : vector<8x512xf32>
    %15 = vector.extract_strided_slice %14 {offsets = [0, 0], sizes = [8, 128], strides = [1, 1]} : vector<8x512xf32> to vector<8x128xf32>
    %16 = arith.negf %15 : vector<8x128xf32>
    %17 = math.exp %16 : vector<8x128xf32>
    %cst_13 = arith.constant 1.000000e+00 : f32
    %18 = vector.broadcast %cst_13 : f32 to vector<8x128xf32>
    %19 = arith.addf %18, %17 : vector<8x128xf32>
    %20 = arith.divf %18, %19 : vector<8x128xf32>
    %21 = vector.extract_strided_slice %14 {offsets = [0, 128], sizes = [8, 128], strides = [1, 1]} : vector<8x512xf32> to vector<8x128xf32>
    %22 = arith.negf %21 : vector<8x128xf32>
    %23 = math.exp %22 : vector<8x128xf32>
    %cst_14 = arith.constant 1.000000e+00 : f32
    %24 = vector.broadcast %cst_14 : f32 to vector<8x128xf32>
    %25 = arith.addf %24, %23 : vector<8x128xf32>
    %26 = arith.divf %24, %25 : vector<8x128xf32>
    %27 = vector.extract_strided_slice %14 {offsets = [0, 256], sizes = [8, 128], strides = [1, 1]} : vector<8x512xf32> to vector<8x128xf32>
    %28 = vector.extract_strided_slice %14 {offsets = [0, 384], sizes = [8, 128], strides = [1, 1]} : vector<8x512xf32> to vector<8x128xf32>
    %29 = arith.mulf %20, %28 : vector<8x128xf32>
    %30 = arith.addf %27, %29 : vector<8x128xf32>
    %31 = math.tanh %30 : vector<8x128xf32>
    %cst_15 = arith.constant 1.000000e+00 : f32
    %32 = vector.broadcast %cst_15 : f32 to vector<8x128xf32>
    %33 = arith.subf %32, %26 : vector<8x128xf32>
    %34 = arith.mulf %33, %31 : vector<8x128xf32>
    %35 = arith.mulf %26, %5 : vector<8x128xf32>
    %36 = arith.addf %34, %35 : vector<8x128xf32>
    %37 = arith.truncf %36 : vector<8x128xf32> to vector<8x128xbf16>
    %38 = arith.truncf %7 : vector<8x128xf32> to vector<8x128xbf16>
    %39 = tpu.concatenate %37, %38 in 1 : vector<8x128xbf16>, vector<8x128xbf16> -> vector<8x256xbf16>
    %c0_16 = arith.constant 0 : index
    %c0_17 = arith.constant 0 : index
    %40 = vector.load %arg3[%c0_16, %c0_17] : memref<256x896xbf16, #tpu.memory_space<vmem>>, vector<256x896xbf16>
    %cst_18 = arith.constant dense<0.000000e+00> : vector<8x896xf32>
    %41 = tpu.matmul %39, %40, %cst_18 {dimension_numbers = #tpu.dot_dimension_numbers<[1], [0], [0], [1], [0, 0, 1, 1], [], []>} : vector<8x256xbf16>, vector<256x896xbf16>, vector<8x896xf32> -> vector<8x896xf32>
    %42 = vector.broadcast %1 : vector<1x896xf32> to vector<8x896xf32>
    %43 = arith.addf %41, %42 : vector<8x896xf32>
    %44 = vector.extract_strided_slice %43 {offsets = [0, 0], sizes = [8, 128], strides = [1, 1]} : vector<8x896xf32> to vector<8x128xf32>
    %45 = arith.negf %44 : vector<8x128xf32>
    %46 = math.exp %45 : vector<8x128xf32>
    %cst_19 = arith.constant 1.000000e+00 : f32
    %47 = vector.broadcast %cst_19 : f32 to vector<8x128xf32>
    %48 = arith.addf %47, %46 : vector<8x128xf32>
    %49 = arith.divf %47, %48 : vector<8x128xf32>
    %50 = vector.extract_strided_slice %43 {offsets = [0, 128], sizes = [8, 128], strides = [1, 1]} : vector<8x896xf32> to vector<8x128xf32>
    %51 = arith.negf %50 : vector<8x128xf32>
    %52 = math.exp %51 : vector<8x128xf32>
    %cst_20 = arith.constant 1.000000e+00 : f32
    %53 = vector.broadcast %cst_20 : f32 to vector<8x128xf32>
    %54 = arith.addf %53, %52 : vector<8x128xf32>
    %55 = arith.divf %53, %54 : vector<8x128xf32>
    %56 = vector.extract_strided_slice %43 {offsets = [0, 256], sizes = [8, 128], strides = [1, 1]} : vector<8x896xf32> to vector<8x128xf32>
    %57 = vector.extract_strided_slice %43 {offsets = [0, 384], sizes = [8, 128], strides = [1, 1]} : vector<8x896xf32> to vector<8x128xf32>
    %58 = arith.mulf %49, %57 : vector<8x128xf32>
    %59 = arith.addf %56, %58 : vector<8x128xf32>
    %60 = math.tanh %59 : vector<8x128xf32>
    %cst_21 = arith.constant 1.000000e+00 : f32
    %61 = vector.broadcast %cst_21 : f32 to vector<8x128xf32>
    %62 = arith.subf %61, %55 : vector<8x128xf32>
    %63 = arith.mulf %62, %60 : vector<8x128xf32>
    %64 = arith.mulf %55, %7 : vector<8x128xf32>
    %65 = arith.addf %63, %64 : vector<8x128xf32>
    %c0_22 = arith.constant 0 : index
    %c0_23 = arith.constant 0 : index
    %c0_24 = arith.constant 0 : index
    %66 = vector.load %arg7[%c0_22, %c0_23, %c0_24] : memref<2x8x128xf32, #tpu.memory_space<vmem>>, vector<1x8x128xf32>
    %67 = vector.shape_cast %66 : vector<1x8x128xf32> to vector<8x128xf32>
    %68 = vector.shape_cast %36 : vector<8x128xf32> to vector<1x8x128xf32>
    tpu.vector_store %arg7[%c0_22, %c0_23, %c0_24], %68 {strides = array<i32>} : memref<2x8x128xf32, #tpu.memory_space<vmem>>, vector<1x8x128xf32>,
    %c1_25 = arith.constant 1 : index
    %c0_26 = arith.constant 0 : index
    %c0_27 = arith.constant 0 : index
    %69 = vector.load %arg7[%c1_25, %c0_26, %c0_27] : memref<2x8x128xf32, #tpu.memory_space<vmem>>, vector<1x8x128xf32>
    %70 = vector.shape_cast %69 : vector<1x8x128xf32> to vector<8x128xf32>
    %71 = vector.shape_cast %65 : vector<8x128xf32> to vector<1x8x128xf32>
    tpu.vector_store %arg7[%c1_25, %c0_26, %c0_27], %71 {strides = array<i32>} : memref<2x8x128xf32, #tpu.memory_space<vmem>>, vector<1x8x128xf32>,
    %72 = vector.extract_strided_slice %43 {offsets = [0, 512], sizes = [8, 256], strides = [1, 1]} : vector<8x896xf32> to vector<8x256xf32>
    %73 = vector.extract_strided_slice %43 {offsets = [0, 768], sizes = [8, 128], strides = [1, 1]} : vector<8x896xf32> to vector<8x128xf32>
    %cst_28 = arith.constant 0.000000e+00 : f32
    %74 = vector.broadcast %cst_28 : f32 to vector<8x128xf32>
    %75 = arith.maximumf %73, %74 : vector<8x128xf32>
    %76 = arith.truncf %65 : vector<8x128xf32> to vector<8x128xbf16>
    %c0_29 = arith.constant 0 : index
    %c0_30 = arith.constant 0 : index
    %77 = vector.load %arg4[%c0_29, %c0_30] : memref<128x128xbf16, #tpu.memory_space<vmem>>, vector<128x128xbf16>
    %cst_31 = arith.constant dense<0.000000e+00> : vector<8x128xf32>
    %78 = tpu.matmul %76, %77, %cst_31 {dimension_numbers = #tpu.dot_dimension_numbers<[1], [0], [0], [1], [0, 0, 1, 1], [], []>} : vector<8x128xbf16>, vector<128x128xbf16>, vector<8x128xf32> -> vector<8x128xf32>
    %79 = vector.broadcast %2 : vector<1x128xf32> to vector<8x128xf32>
    %80 = arith.addf %78, %79 : vector<8x128xf32>
    %cst_32 = arith.constant 0.000000e+00 : f32
    %81 = vector.broadcast %cst_32 : f32 to vector<8x128xf32>
    %82 = arith.maximumf %80, %81 : vector<8x128xf32>
    %83 = tpu.concatenate %72, %82, %75 in 1 : vector<8x256xf32>, vector<8x128xf32>, vector<8x128xf32> -> vector<8x512xf32>
    %84 = arith.truncf %83 : vector<8x512xf32> to vector<8x512xbf16>
    %c0_33 = arith.constant 0 : index
    %c0_34 = arith.constant 0 : index
    %85 = vector.load %arg5[%c0_33, %c0_34] : memref<512x128xbf16, #tpu.memory_space<vmem>>, vector<512x128xbf16>
    %cst_35 = arith.constant dense<0.000000e+00> : vector<8x128xf32>
    %86 = tpu.matmul %84, %85, %cst_35 {dimension_numbers = #tpu.dot_dimension_numbers<[1], [0], [0], [1], [0, 0, 1, 1], [], []>} : vector<8x512xbf16>, vector<512x128xbf16>, vector<8x128xf32> -> vector<8x128xf32>
    %87 = vector.broadcast %3 : vector<1x128xf32> to vector<8x128xf32>
    %88 = arith.addf %86, %87 : vector<8x128xf32>
    %c0_36 = arith.constant 0 : index
    %c0_37 = arith.constant 0 : index
    %89 = vector.load %arg8[%c0_36, %c0_37] : memref<8x128xf32, #tpu.memory_space<vmem>>, vector<8x128xf32>
    tpu.vector_store %arg8[%c0_36, %c0_37], %88 {strides = array<i32>} : memref<8x128xf32, #tpu.memory_space<vmem>>, vector<8x128xf32>,
    return
  }
}

</mosaic_0001>

<bundles_post_ra>
// kernel: decoder_rnn_forward.1
= control target key start
LH: loop header
LB: loop body
LE: loop exit
PB: predicated region body
PF: predicated region fallthrough
CT: control target
= control target key end

     0   :  { %14 = vsyncpa [#allocation3], 0  ;;  %s2929_s0 = inlined_call_operand.vmem [shape: bf16[8,128], index: 0, kind: input, shape index: {}]   ;;  %s2930_s1 = inlined_call_operand.vmem [shape: f32[2,8,128], index: 1, kind: input, shape index: {}, may-alias: {1,7}]   ;;  %s2931_s2 = inlined_call_operand.hbm [shape: bf16[256,512], index: 2, kind: input, shape index: {}]   ;;  %s2932_s3 = inlined_call_operand.hbm [shape: bf16[256,896], index: 3, kind: input, shape index: {}]   ;;  %s2933_s4 = inlined_call_operand.hbm [shape: bf16[128,128], index: 4, kind: input, shape index: {}]   ;;  %s2934_s5 = inlined_call_operand.hbm [shape: bf16[512,128], index: 5, kind: input, shape index: {}]   ;;  %s2935_s6 = inlined_call_operand.vmem [shape: f32[1,1664], index: 6, kind: input, shape index: {}]   ;;  %s2936_s7 = inlined_call_operand.vmem [shape: f32[2,8,128], index: 7, kind: output, shape index: {0}, may-alias: {1,7}]   ;;  %s2937_s8 = inlined_call_operand.vmem [shape: f32[8,128], index: 8, kind: output, shape index: {1}]  }
   0x1   :  { %15 = vsyncpa [#allocation5], 0 }
   0x2   :  { %16 = vsyncpa [#allocation8], 0  ;;  %s2738_s27 = smov [#allocation4]   ;;  %s2644_s9 = scalar_lea.hbm %s2932_s3, 14336 }
   0x3   :  { %s38_s28 = sshll.u32 %s2738_s27, 4  ;;  %p2645_p0 = scmp.ne.s32.totalorder %s2932_s3, %s2644_s9  ;;  %s39_s28 = int_to_ptr.vmem [resolvable:$true] %s38_s28 }
   0x4   :  { %p2648_p1 = scmp.lt.u32.totalorder %s2644_s9, %s2932_s3 }
   0x6   :  { %p2650_p2 = pnand %p2648_p1, %p2645_p0 }
   0x8   :  { %2653 = shalt.err (!%p2650_p2)
}
   0x9   :  { %s2654_s14 = scalar_lea.vmem %s39_s28, 14336  ;;  %p2659_p4 = scmp.lt.s32.totalorder %s39_s28, %s39_s28 }
   0xa   :  { %p2655_p3 = scmp.ne.s32.totalorder %s39_s28, %s2654_s14  ;;  %p2660_p5 = scmp.lt.s32.totalorder %s2654_s14, %s2654_s14 }
   0xc   :  { %p2661_p6 = por %p2660_p5, %p2659_p4 }
   0xe   :  { %p2662_p7 = pnand %p2661_p6, %p2655_p3 }
  0x10   :  { %2665 = shalt.err (!%p2662_p7)
}
  0x11   :  { %s2739_s15 = smov 448   ;;  %s2740_s16 = smov 28  }
  0x12   :  { %44 = dma.hbm_to_vmem [thread:$0]  %s2932_s3, 14336, %s39_s28, [#allocation5], %s2739_s15, %s2739_s15, %s2740_s16  }
  0x13   :  { %s2741_s19 = smov [#allocation2]   ;;  %s2666_s23 = scalar_lea.hbm %s2931_s2, 8192 }
  0x14   :  { %s26_s20 = sshll.u32 %s2741_s19, 4  ;;  %p2667_p8 = scmp.ne.s32.totalorder %s2931_s2, %s2666_s23  ;;  %s27_s20 = int_to_ptr.vmem [resolvable:$true] %s26_s20 }
  0x15   :  { %p2670_p9 = scmp.lt.u32.totalorder %s2666_s23, %s2931_s2 }
  0x17   :  { %p2672_p10 = pnand %p2670_p9, %p2667_p8 }
  0x19   :  { %2675 = shalt.err (!%p2672_p10)
}
  0x1a   :  { %s2676_s29 = scalar_lea.vmem %s27_s20, 8192  ;;  %p2681_p12 = scmp.lt.s32.totalorder %s27_s20, %s27_s20 }
  0x1b   :  { %p2677_p11 = scmp.ne.s32.totalorder %s27_s20, %s2676_s29  ;;  %p2682_p13 = scmp.lt.s32.totalorder %s2676_s29, %s2676_s29 }
  0x1d   :  { %p2683_p0 = por %p2682_p13, %p2681_p12 }
  0x1f   :  { %p2684_p1 = pnand %p2683_p0, %p2677_p11 }
  0x21   :  { %2687 = shalt.err (!%p2684_p1)
}
  0x22   :  { %s2742_s3 = smov 256   ;;  %s2743_s28 = smov 16  }
  0x23   :  { %32 = dma.hbm_to_vmem [thread:$0]  %s2931_s2, 8192, %s27_s20, [#allocation3], %s2742_s3, %s2742_s3, %s2743_s28  }
  0x24   :  { %s2744_s10 = smov [#allocation6]   ;;  %s2688_s14 = scalar_lea.hbm %s2933_s4, 1024 }
  0x25   :  { %s50_s11 = sshll.u32 %s2744_s10, 4  ;;  %p2689_p2 = scmp.ne.s32.totalorder %s2933_s4, %s2688_s14  ;;  %s51_s11 = int_to_ptr.vmem [resolvable:$true] %s50_s11 }
  0x26   :  { %p2692_p3 = scmp.lt.u32.totalorder %s2688_s14, %s2933_s4 }
  0x28   :  { %p2694_p4 = pnand %p2692_p3, %p2689_p2 }
  0x2a   :  { %2697 = shalt.err (!%p2694_p4)
}
  0x2b   :  { %s2698_s19 = scalar_lea.vmem %s51_s11, 1024  ;;  %p2703_p6 = scmp.lt.s32.totalorder %s51_s11, %s51_s11 }
  0x2c   :  { %p2699_p5 = scmp.ne.s32.totalorder %s51_s11, %s2698_s19  ;;  %p2704_p7 = scmp.lt.s32.totalorder %s2698_s19, %s2698_s19 }
  0x2e   :  { %p2705_p8 = por %p2704_p7, %p2703_p6 }
  0x30   :  { %p2706_p9 = pnand %p2705_p8, %p2699_p5 }
  0x32   :  { %2709 = shalt.err (!%p2706_p9)
}
  0x33   :  { %s2745_s2 = smov 64   ;;  %s2746_s20 = smov 4  }
  0x34   :  { %56 = dma.hbm_to_vmem [thread:$0]  %s2933_s4, 1024, %s51_s11, [#allocation5], %s2745_s2, %s2745_s2, %s2746_s20  }
  0x35   :  { %s2747_s23 = smov [#allocation7]   ;;  %s2710_s27 = scalar_lea.hbm %s2934_s5, 4096 }
  0x36   :  { %s62_s24 = sshll.u32 %s2747_s23, 4  ;;  %p2711_p10 = scmp.ne.s32.totalorder %s2934_s5, %s2710_s27  ;;  %s63_s24 = int_to_ptr.vmem [resolvable:$true] %s62_s24 }
  0x37   :  { %p2714_p11 = scmp.lt.u32.totalorder %s2710_s27, %s2934_s5 }
  0x39   :  { %p2716_p12 = pnand %p2714_p11, %p2711_p10 }
  0x3b   :  { %2719 = shalt.err (!%p2716_p12)
}
  0x3c   :  { %s2720_s9 = scalar_lea.vmem %s63_s24, 4096  ;;  %p2725_p0 = scmp.lt.s32.totalorder %s63_s24, %s63_s24 }
  0x3d   :  { %p2721_p13 = scmp.ne.s32.totalorder %s63_s24, %s2720_s9  ;;  %p2726_p1 = scmp.lt.s32.totalorder %s2720_s9, %s2720_s9 }
  0x3f   :  { %p2727_p2 = por %p2726_p1, %p2725_p0 }
  0x41   :  { %p2728_p3 = pnand %p2727_p2, %p2721_p13 }
  0x43   :  { %2731 = shalt.err (!%p2728_p3)
}
  0x44   :  { %68 = dma.hbm_to_vmem [thread:$0]  %s2934_s5, 4096, %s63_s24, [#allocation8], %s2745_s2, %s2745_s2, %s2746_s20  }
  0x45   :  { %2732 = dma.done.wait [#allocation3], 8192  }
  0x46   :  { %2733 = vsyncadd [#allocation3], 4294959104 }
  0x47   :  { %2734 = dma.done.wait [#allocation5], 15360  }
  0x48   :  { %2735 = vsyncadd [#allocation5], 4294951936 }
  0x49   :  { %2736 = dma.done.wait [#allocation8], 4096  }
  0x4a   :  { %2737 = vsyncadd [#allocation8], 4294963200  ;;  %v2328_v0 = vld [vmem:[#allocation2 + $0x4] ss:$16 sps:$4 sm:$0xff]   ;;  %v2330_v1 = vld [vmem:[#allocation2] ss:$16 sps:$4 sm:$0xff]  }
  0x4b   :  { %498 = vmatprep.subr.bf16.mxu0 %v2328_v0  ;;  %v2331_v2 = vld [vmem:[#allocation2 + $0x24] ss:$16 sps:$4 sm:$0xff]   ;;  %v2333_v3 = vld [vmem:[#allocation2 + $0x20] ss:$16 sps:$4 sm:$0xff]   ;;  %v2346_v7 = vld [vmem:[#allocation2 + $0xc] ss:$16 sps:$4 sm:$0xff]  }
  0x4c   :  { %499 = vmatpush1.bf16.msra.mxu0 %v2330_v1  ;;  %v2334_v4 = vld [vmem:[#allocation2 + $0x44] ss:$16 sps:$4 sm:$0xff]   ;;  %v2336_v5 = vld [vmem:[#allocation2 + $0x40] ss:$16 sps:$4 sm:$0xff]   ;;  %v2348_v8 = vld [vmem:[#allocation2 + $0x8] ss:$16 sps:$4 sm:$0xff]   ;;  %539 = vmatprep.subr.bf16.mxu1 %v2346_v7 }
  0x4d   :  { %500 = vmatprep.subr.bf16.mxu0 %v2331_v2  ;;  %v2337_v6 = vld [vmem:[#allocation2 + $0x64] ss:$16 sps:$4 sm:$0xff]   ;;  %v2339_v9 = vld [vmem:[#allocation2 + $0x60] ss:$16 sps:$4 sm:$0xff]   ;;  %540 = vmatpush1.bf16.msra.mxu1 %v2348_v8  ;;  %v2352_v10 = vld [vmem:[#allocation2 + $0x2c] ss:$16 sps:$4 sm:$0xff]  }
  0x4e   :  { %v2354_v11 = vld [vmem:[#allocation2 + $0x28] ss:$16 sps:$4 sm:$0xff]   ;;  %v2340_v12 = vld [vmem:[#allocation2 + $0x84] ss:$16 sps:$4 sm:$0xff]   ;;  %541 = vmatprep.subr.bf16.mxu1 %v2352_v10  ;;  %v2342_v13 = vld [vmem:[#allocation2 + $0x80] ss:$16 sps:$4 sm:$0xff]  }
  0x4f   :  { %v2358_v14 = vld [vmem:[#allocation2 + $0x4c] ss:$16 sps:$4 sm:$0xff]   ;;  %v2343_v15 = vld [vmem:[#allocation2 + $0xa4] ss:$16 sps:$4 sm:$0xff]   ;;  %v2360_v16 = vld [vmem:[#allocation2 + $0x48] ss:$16 sps:$4 sm:$0xff]  }
  0x50   :  { %501 = vmatpush1.bf16.msra.mxu0 %v2333_v3  ;;  %v2364_v17 = vld [vmem:[#allocation2 + $0x6c] ss:$16 sps:$4 sm:$0xff]   ;;  %v2345_v18 = vld [vmem:[#allocation2 + $0xa0] ss:$16 sps:$4 sm:$0xff]   ;;  %v2349_v19 = vld [vmem:[#allocation2 + $0xc4] ss:$16 sps:$4 sm:$0xff]  }
  0x51   :  { %502 = vmatprep.subr.bf16.mxu0 %v2334_v4  ;;  %542 = vmatpush1.bf16.msra.mxu1 %v2354_v11  ;;  %v2366_v20 = vld [vmem:[#allocation2 + $0x68] ss:$16 sps:$4 sm:$0xff]   ;;  %v2370_v21 = vld [vmem:[#allocation2 + $0x8c] ss:$16 sps:$4 sm:$0xff]   ;;  %v2351_v22 = vld [vmem:[#allocation2 + $0xc0] ss:$16 sps:$4 sm:$0xff]  }
  0x52   :  { %543 = vmatprep.subr.bf16.mxu1 %v2358_v14  ;;  %v2355_v23 = vld [vmem:[#allocation2 + $0xe4] ss:$16 sps:$4 sm:$0xff]   ;;  %v2372_v24 = vld [vmem:[#allocation2 + $0x88] ss:$16 sps:$4 sm:$0xff]   ;;  %v2376_v25 = vld [vmem:[#allocation2 + $0xac] ss:$16 sps:$4 sm:$0xff]  }
  0x53   :  { %v2357_v26 = vld [vmem:[#allocation2 + $0xe0] ss:$16 sps:$4 sm:$0xff]   ;;  %v2361_v27 = vld [vmem:[#allocation2 + $0x104] ss:$16 sps:$4 sm:$0xff]   ;;  %v2378_v28 = vld [vmem:[#allocation2 + $0xa8] ss:$16 sps:$4 sm:$0xff]  }
  0x54   :  { %503 = vmatpush1.bf16.msra.mxu0 %v2336_v5  ;;  %v2382_v29 = vld [vmem:[#allocation2 + $0xcc] ss:$16 sps:$4 sm:$0xff]   ;;  %v2363_v30 = vld [vmem:[#allocation2 + $0x100] ss:$16 sps:$4 sm:$0xff]   ;;  %v2367_v31 = vld [vmem:[#allocation2 + $0x124] ss:$16 sps:$4 sm:$0xff]  }
  0x55   :  { %504 = vmatprep.subr.bf16.mxu0 %v2337_v6  ;;  %544 = vmatpush1.bf16.msra.mxu1 %v2360_v16  ;;  %v2384_v32 = vld [vmem:[#allocation2 + $0xc8] ss:$16 sps:$4 sm:$0xff]   ;;  %v2388_v33 = vld [vmem:[#allocation2 + $0xec] ss:$16 sps:$4 sm:$0xff]   ;;  %v2369_v34 = vld [vmem:[#allocation2 + $0x120] ss:$16 sps:$4 sm:$0xff]  }
  0x56   :  { %545 = vmatprep.subr.bf16.mxu1 %v2364_v17  ;;  %v2390_v35 = vld [vmem:[#allocation2 + $0xe8] ss:$16 sps:$4 sm:$0xff]   ;;  %v2846_v36 = vld [vmem:[%s2930_s1] sm:$0xff]  ;;  %v2394_v38 = vld [vmem:[#allocation2 + $0x10c] ss:$16 sps:$4 sm:$0xff]   ;;  %vm2749_vm0 = vmmov 0  }
  0x57   :  { %v2373_v37 = vld [vmem:[#allocation2 + $0x144] ss:$16 sps:$4 sm:$0xff]   ;;  %v92_v39 = vpack.c.bf16 %v2846_v36, %v2846_v36  ;;  %v2375_v40 = vld [vmem:[#allocation2 + $0x140] ss:$16 sps:$4 sm:$0xff]   ;;  %v2396_v41 = vld [vmem:[#allocation2 + $0x108] ss:$16 sps:$4 sm:$0xff]  }
  0x58   :  { %505 = vmatpush1.bf16.msra.mxu0 %v2339_v9  ;;  %v2379_v42 = vld [vmem:[#allocation2 + $0x164] ss:$16 sps:$4 sm:$0xff]   ;;  %v2400_v43 = vld [vmem:[#allocation2 + $0x12c] ss:$16 sps:$4 sm:$0xff]   ;;  %v2381_v44 = vld [vmem:[#allocation2 + $0x160] ss:$16 sps:$4 sm:$0xff]  }
  0x59   :  { %506 = vmatprep.subr.bf16.mxu0 %v2340_v12  ;;  %546 = vmatpush1.bf16.msra.mxu1 %v2366_v20  ;;  %v2402_v45 = vld [vmem:[#allocation2 + $0x128] ss:$16 sps:$4 sm:$0xff]   ;;  %v2385_v46 = vld [vmem:[#allocation2 + $0x184] ss:$16 sps:$4 sm:$0xff]   ;;  %v2406_v47 = vld [vmem:[#allocation2 + $0x14c] ss:$16 sps:$4 sm:$0xff]  }
  0x5a   :  { %547 = vmatprep.subr.bf16.mxu1 %v2370_v21  ;;  %530 = vmatprep.mubr.bf16.mxu0 %v92_v39  ;;  %v2387_v48 = vld [vmem:[#allocation2 + $0x180] ss:$16 sps:$4 sm:$0xff]   ;;  %v2408_v49 = vld [vmem:[#allocation2 + $0x148] ss:$16 sps:$4 sm:$0xff]   ;;  %v2391_v50 = vld [vmem:[#allocation2 + $0x1a4] ss:$16 sps:$4 sm:$0xff]  }
  0x5b   :  { %571 = vmatprep.mubr.bf16.mxu1 %v92_v39  ;;  %v2409_v51 = vld [vmem:[#allocation2 + $0x16c] ss:$16 sps:$4 sm:$0xff]   ;;  %v2393_v52 = vld [vmem:[#allocation2 + $0x1a0] ss:$16 sps:$4 sm:$0xff]   ;;  %v2411_v53 = vld [vmem:[#allocation2 + $0x168] ss:$16 sps:$4 sm:$0xff]  }
  0x5c   :  { %507 = vmatpush1.bf16.msra.mxu0 %v2342_v13  ;;  %v2397_v54 = vld [vmem:[#allocation2 + $0x1c4] ss:$16 sps:$4 sm:$0xff]   ;;  %v2412_v55 = vld [vmem:[#allocation2 + $0x18c] ss:$16 sps:$4 sm:$0xff]   ;;  %v2399_v56 = vld [vmem:[#allocation2 + $0x1c0] ss:$16 sps:$4 sm:$0xff]  }
  0x5d   :  { %508 = vmatprep.subr.bf16.mxu0 %v2343_v15  ;;  %548 = vmatpush1.bf16.msra.mxu1 %v2372_v24  ;;  %v2414_v57 = vld [vmem:[#allocation2 + $0x188] ss:$16 sps:$4 sm:$0xff]   ;;  %v2403_v58 = vld [vmem:[#allocation2 + $0x1e4] ss:$16 sps:$4 sm:$0xff]   ;;  %v2415_v59 = vld [vmem:[#allocation2 + $0x1ac] ss:$16 sps:$4 sm:$0xff]  }
  0x5e   :  { %549 = vmatprep.subr.bf16.mxu1 %v2376_v25  ;;  %v2405_v60 = vld [vmem:[#allocation2 + $0x1e0] ss:$16 sps:$4 sm:$0xff]   ;;  %v2417_v61 = vld [vmem:[#allocation2 + $0x1a8] ss:$16 sps:$4 sm:$0xff]   ;;  %v2418_v62 = vld [vmem:[#allocation2 + $0x1cc] ss:$16 sps:$4 sm:$0xff]  }
  0x5f   :  { %v2426_v63 = vld [vmem:[#allocation4 + $0x4] ss:$28 sps:$4 sm:$0xff]   ;;  %v2420_v1 = vld [vmem:[#allocation2 + $0x1c8] ss:$16 sps:$4 sm:$0xff]   ;;  %v2421_v3 = vld [vmem:[#allocation2 + $0x1ec] ss:$16 sps:$4 sm:$0xff]  }
  0x60   :  { %509 = vmatpush1.bf16.msra.mxu0 %v2345_v18  ;;  %v91_v0 = vld [vmem:[%s2929_s0] sm:$0xf]  ;;  %v2432_v4 = vld [vmem:[#allocation4 + $0x3c] ss:$28 sps:$4 sm:$0xff]   ;;  %v2429_v7 = vld [vmem:[#allocation4 + $0xc] ss:$28 sps:$4 sm:$0xff]  }
  0x61   :  { %510 = vmatprep.subr.bf16.mxu0 %v2349_v19  ;;  %550 = vmatpush1.bf16.msra.mxu1 %v2378_v28  ;;  %v2424_v2 = vld [vmem:[#allocation4] ss:$28 sps:$4 sm:$0xff]   ;;  %v2423_v5 = vld [vmem:[#allocation2 + $0x1e8] ss:$16 sps:$4 sm:$0xff]   ;;  %v2438_v8 = vld [vmem:[#allocation4 + $0x74] ss:$28 sps:$4 sm:$0xff]  }
  0x62   :  { %551 = vmatprep.subr.bf16.mxu1 %v2382_v29  ;;  %v2430_v6 = vld [vmem:[#allocation4 + $0x38] ss:$28 sps:$4 sm:$0xff]   ;;  %v2427_v9 = vld [vmem:[#allocation4 + $0x8] ss:$28 sps:$4 sm:$0xff]   ;;  %v2436_v10 = vld [vmem:[#allocation4 + $0x70] ss:$28 sps:$4 sm:$0xff]  }
  0x63   :  { %v2435_v11 = vld [vmem:[#allocation4 + $0x44] ss:$28 sps:$4 sm:$0xff]   ;;  %v2444_v12 = vld [vmem:[#allocation4 + $0xac] ss:$28 sps:$4 sm:$0xff]   ;;  %v2441_v15 = vld [vmem:[#allocation4 + $0x7c] ss:$28 sps:$4 sm:$0xff]  }
  0x64   :  { %511 = vmatpush1.bf16.msra.mxu0 %v2351_v22  ;;  %v2433_v13 = vld [vmem:[#allocation4 + $0x40] ss:$28 sps:$4 sm:$0xff]   ;;  %v2442_v14 = vld [vmem:[#allocation4 + $0xa8] ss:$28 sps:$4 sm:$0xff]   ;;  %v2439_v16 = vld [vmem:[#allocation4 + $0x78] ss:$28 sps:$4 sm:$0xff]  }
  0x65   :  { %512 = vmatprep.subr.bf16.mxu0 %v2355_v23  ;;  %552 = vmatpush1.bf16.msra.mxu1 %v2384_v32  ;;  %v2447_v17 = vld [vmem:[#allocation4 + $0xb4] ss:$28 sps:$4 sm:$0xff]   ;;  %v2450_v19 = vld [vmem:[#allocation4 + $0xe4] ss:$28 sps:$4 sm:$0xff]   ;;  %v2453_v20 = vld [vmem:[#allocation4 + $0xec] ss:$28 sps:$4 sm:$0xff]  }
  0x66   :  { %553 = vmatprep.subr.bf16.mxu1 %v2388_v33  ;;  %v2445_v18 = vld [vmem:[#allocation4 + $0xb0] ss:$28 sps:$4 sm:$0xff]   ;;  %v2448_v21 = vld [vmem:[#allocation4 + $0xe0] ss:$28 sps:$4 sm:$0xff]   ;;  %v2451_v22 = vld [vmem:[#allocation4 + $0xe8] ss:$28 sps:$4 sm:$0xff]  }
  0x67   :  { %v2456_v23 = vld [vmem:[#allocation4 + $0x11c] ss:$28 sps:$4 sm:$0xff]   ;;  %v2459_v24 = vld [vmem:[#allocation4 + $0x124] ss:$28 sps:$4 sm:$0xff]   ;;  %v2460_v29 = vld [vmem:[#allocation4 + $0x150] ss:$28 sps:$4 sm:$0xff]  }
  0x68   :  { %513 = vmatpush1.bf16.msra.mxu0 %v2357_v26  ;;  %v2454_v25 = vld [vmem:[#allocation4 + $0x118] ss:$28 sps:$4 sm:$0xff]   ;;  %v2457_v26 = vld [vmem:[#allocation4 + $0x120] ss:$28 sps:$4 sm:$0xff]   ;;  %v2466_v33 = vld [vmem:[#allocation4 + $0x188] ss:$28 sps:$4 sm:$0xff]  }
  0x69   :  { %514 = vmatprep.subr.bf16.mxu0 %v2361_v27  ;;  %554 = vmatpush1.bf16.msra.mxu1 %v2390_v35  ;;  %v2462_v27 = vld [vmem:[#allocation4 + $0x154] ss:$28 sps:$4 sm:$0xff]   ;;  %v2465_v28 = vld [vmem:[#allocation4 + $0x15c] ss:$28 sps:$4 sm:$0xff]   ;;  %v2474_v35 = vld [vmem:[#allocation4 + $0x1c4] ss:$28 sps:$4 sm:$0xff]  }
  0x6a   :  { %555 = vmatprep.subr.bf16.mxu1 %v2394_v38  ;;  %v2471_v32 = vld [vmem:[#allocation4 + $0x194] ss:$28 sps:$4 sm:$0xff]   ;;  %v2472_v38 = vld [vmem:[#allocation4 + $0x1c0] ss:$28 sps:$4 sm:$0xff]   ;;  %v2475_v39 = vld [vmem:[#allocation4 + $0x1c8] ss:$28 sps:$4 sm:$0xff]  }
  0x6c   :  { %515 = vmatpush1.bf16.msra.mxu0 %v2363_v30  ;;  %v2463_v30 = vld [vmem:[#allocation4 + $0x158] ss:$28 sps:$4 sm:$0xff]  }
  0x6d   :  { %516 = vmatprep.subr.bf16.mxu0 %v2367_v31  ;;  %556 = vmatpush1.bf16.msra.mxu1 %v2396_v41  ;;  %v2468_v31 = vld [vmem:[#allocation4 + $0x18c] ss:$28 sps:$4 sm:$0xff]   ;;  %v2480_v41 = vld [vmem:[#allocation4 + $0x1fc] ss:$28 sps:$4 sm:$0xff]  }
  0x6e   :  { %557 = vmatprep.subr.bf16.mxu1 %v2400_v43  ;;  %v2483_v43 = vld [vmem:[#allocation4 + $0x204] ss:$28 sps:$4 sm:$0xff]  }
  0x70   :  { %517 = vmatpush1.bf16.msra.mxu0 %v2369_v34  ;;  %v2469_v34 = vld [vmem:[#allocation4 + $0x190] ss:$28 sps:$4 sm:$0xff]  }
  0x71   :  { %518 = vmatprep.subr.bf16.mxu0 %v2373_v37  ;;  %558 = vmatpush1.bf16.msra.mxu1 %v2402_v45  ;;  %v2477_v37 = vld [vmem:[#allocation4 + $0x1cc] ss:$28 sps:$4 sm:$0xff]   ;;  %v2489_v45 = vld [vmem:[#allocation4 + $0x23c] ss:$28 sps:$4 sm:$0xff]  }
  0x72   :  { %559 = vmatprep.subr.bf16.mxu1 %v2406_v47  ;;  %v2487_v47 = vld [vmem:[#allocation4 + $0x238] ss:$28 sps:$4 sm:$0xff]  }
  0x74   :  { %519 = vmatpush1.bf16.msra.mxu0 %v2375_v40  ;;  %v2478_v40 = vld [vmem:[#allocation4 + $0x1f8] ss:$28 sps:$4 sm:$0xff]  }
  0x75   :  { %520 = vmatprep.subr.bf16.mxu0 %v2379_v42  ;;  %560 = vmatpush1.bf16.msra.mxu1 %v2408_v49  ;;  %v2481_v42 = vld [vmem:[#allocation4 + $0x200] ss:$28 sps:$4 sm:$0xff]   ;;  %v2495_v49 = vld [vmem:[#allocation4 + $0x274] ss:$28 sps:$4 sm:$0xff]  }
  0x76   :  { %561 = vmatprep.subr.bf16.mxu1 %v2409_v51  ;;  %v2493_v51 = vld [vmem:[#allocation4 + $0x270] ss:$28 sps:$4 sm:$0xff]  }
  0x78   :  { %521 = vmatpush1.bf16.msra.mxu0 %v2381_v44  ;;  %v2486_v44 = vld [vmem:[#allocation4 + $0x234] ss:$28 sps:$4 sm:$0xff]  }
  0x79   :  { %522 = vmatprep.subr.bf16.mxu0 %v2385_v46  ;;  %562 = vmatpush1.bf16.msra.mxu1 %v2411_v53  ;;  %v2484_v46 = vld [vmem:[#allocation4 + $0x230] ss:$28 sps:$4 sm:$0xff]  }
  0x7a   :  { %563 = vmatprep.subr.bf16.mxu1 %v2412_v55  ;;  %v2501_v53 = vld [vmem:[#allocation4 + $0x2ac] ss:$28 sps:$4 sm:$0xff]  }
  0x7b   :  { %v2499_v55 = vld [vmem:[#allocation4 + $0x2a8] ss:$28 sps:$4 sm:$0xff]  }
  0x7c   :  { %523 = vmatpush1.bf16.msra.mxu0 %v2387_v48  ;;  %v2492_v48 = vld [vmem:[#allocation4 + $0x26c] ss:$28 sps:$4 sm:$0xff]  }
  0x7d   :  { %524 = vmatprep.subr.bf16.mxu0 %v2391_v50  ;;  %564 = vmatpush1.bf16.msra.mxu1 %v2414_v57  ;;  %v2490_v50 = vld [vmem:[#allocation4 + $0x268] ss:$28 sps:$4 sm:$0xff]   ;;  %v2502_v57 = vld [vmem:[#allocation4 + $0x2d8] ss:$28 sps:$4 sm:$0xff]  }
  0x7e   :  { %565 = vmatprep.subr.bf16.mxu1 %v2415_v59  ;;  %v2505_v59 = vld [vmem:[#allocation4 + $0x2e0] ss:$28 sps:$4 sm:$0xff]  }
  0x80   :  { %525 = vmatpush1.bf16.msra.mxu0 %v2393_v52  ;;  %v2498_v52 = vld [vmem:[#allocation4 + $0x2a4] ss:$28 sps:$4 sm:$0xff]  }
  0x81   :  { %526 = vmatprep.subr.bf16.mxu0 %v2397_v54  ;;  %566 = vmatpush1.bf16.msra.mxu1 %v2417_v61  ;;  %v2496_v54 = vld [vmem:[#allocation4 + $0x2a0] ss:$28 sps:$4 sm:$0xff]  }
  0x82   :  { %567 = vmatprep.subr.bf16.mxu1 %v2418_v62  ;;  %v2513_v61 = vld [vmem:[#allocation4 + $0x31c] ss:$28 sps:$4 sm:$0xff]   ;;  %v2856_v62 = vld [vmem:[%s2930_s1 + $0x8] sm:$0xff] }
  0x84   :  { %527 = vmatpush1.bf16.msra.mxu0 %v2399_v56  ;;  %v2504_v56 = vld [vmem:[#allocation4 + $0x2dc] ss:$28 sps:$4 sm:$0xff]  }
  0x85   :  { %528 = vmatprep.subr.bf16.mxu0 %v2403_v58  ;;  %568 = vmatpush1.bf16.msra.mxu1 %v2420_v1  ;;  %v2507_v58 = vld [vmem:[#allocation4 + $0x2e4] ss:$28 sps:$4 sm:$0xff]   ;;  %v2511_v1 = vld [vmem:[#allocation4 + $0x318] ss:$28 sps:$4 sm:$0xff]  }
  0x86   :  { %569 = vmatprep.subr.bf16.mxu1 %v2421_v3  ;;  %v2519_v3 = vld [vmem:[#allocation4 + $0x354] ss:$28 sps:$4 sm:$0xff]  }
  0x88   :  { %529 = vmatpush1.bf16.msra.mxu0 %v2405_v60  ;;  %v2510_v60 = vld [vmem:[#allocation4 + $0x314] ss:$28 sps:$4 sm:$0xff]  }
  0x89   :  { %1341 = vmatprep.subr.bf16.mxu0 %v2426_v63  ;;  %570 = vmatpush1.bf16.msra.mxu1 %v2423_v5  ;;  %v2508_v63 = vld [vmem:[#allocation4 + $0x310] ss:$28 sps:$4 sm:$0xff]  }
  0x8a   :  { %1382 = vmatprep.subr.bf16.mxu1 %v2429_v7  ;;  %v2517_v5 = vld [vmem:[#allocation4 + $0x350] ss:$28 sps:$4 sm:$0xff]   ;;  %v2523_v7 = vld [vmem:[#allocation4 + $0x1d8] ss:$28 sps:$4 sm:$0xff]  }
  0x8b   :  { %531 = vmatmul.mubr.bf16.vlgmr.msra.gmra.mrb[0].mxu0 %v91_v0 }
  0x8c   :  { %1342 = vmatpush1.bf16.msra.mxu0 %v2424_v2  ;;  %572 = vmatmul.mubr.bf16.vlgmr.msra.gmra.mrb[0].mxu1 %v91_v0  ;;  %v2860_v0 = vpack.c.bf16 %v2856_v62, %v2856_v62  ;;  %v2516_v2 = vld [vmem:[#allocation4 + $0x34c] ss:$28 sps:$4 sm:$0xff]  }
  0x8d   :  { %1343 = vmatprep.subr.bf16.mxu0 %v2432_v4  ;;  %1383 = vmatpush1.bf16.msra.mxu1 %v2427_v9  ;;  %v2514_v4 = vld [vmem:[#allocation4 + $0x348] ss:$28 sps:$4 sm:$0xff]  }
  0x8e   :  { %1384 = vmatprep.subr.bf16.mxu1 %v2435_v11  ;;  %1373 = vmatprep.mubr.bf16.mxu0 %v2860_v0  ;;  %v84_v11 = vld [vmem:[%s2935_s6] sm:$0xf] }
  0x8f   :  { %1414 = vmatprep.mubr.bf16.mxu1 %v2860_v0 }
  0x90   :  { %1344 = vmatpush1.bf16.msra.mxu0 %v2430_v6  ;;  %v2522_v6 = vld [vmem:[#allocation4 + $0x14] ss:$28 sps:$4 sm:$0xff]  }
  0x91   :  { %1345 = vmatprep.subr.bf16.mxu0 %v2438_v8  ;;  %1385 = vmatpush1.bf16.msra.mxu1 %v2433_v13  ;;  %v158_v8 = vlaneseq }
  0x92   :  { %1386 = vmatprep.subr.bf16.mxu1 %v2441_v15 }
  0x93   :  { %v2864_v9 = vshrl.u32 %v158_v8, 7  ;;  %v2550_v8 = vld [vmem:[#allocation4 + $0x160] ss:$28 sps:$4 sm:$0xff]  }
  0x94   :  { %1346 = vmatpush1.bf16.msra.mxu0 %v2436_v10 }
  0x95   :  { %1347 = vmatprep.subr.bf16.mxu0 %v2444_v12  ;;  %1387 = vmatpush1.bf16.msra.mxu1 %v2439_v16  ;;  %v160_v10 = vsub.s32 0, %v2864_v9  ;;  %v164_v12 = vsub.s32 1, %v2864_v9 }
  0x96   :  { %1388 = vmatprep.subr.bf16.mxu1 %v2447_v17 }
  0x97   :  { %v161_v13 = vrot.slane %v84_v11, %v160_v10  ;;  %v165_v15 = vrot.slane %v84_v11, %v164_v12 }
  0x98   :  { %1348 = vmatpush1.bf16.msra.mxu0 %v2442_v14 }
  0x99   :  { %1389 = vmatpush1.bf16.msra.mxu1 %v2445_v18  ;;  %1349 = vmatprep.subr.bf16.mxu0 %v2450_v19 }
  0x9a   :  { %1390 = vmatprep.subr.bf16.mxu1 %v2453_v20 }
  0x9c   :  { %1350 = vmatpush1.bf16.msra.mxu0 %v2448_v21 }
  0x9d   :  { %1391 = vmatpush1.bf16.msra.mxu1 %v2451_v22  ;;  %1351 = vmatprep.subr.bf16.mxu0 %v2456_v23 }
  0x9e   :  { %1392 = vmatprep.subr.bf16.mxu1 %v2459_v24 }
  0xa0   :  { %1352 = vmatpush1.bf16.msra.mxu0 %v2454_v25 }
  0xa1   :  { %1393 = vmatpush1.bf16.msra.mxu1 %v2457_v26  ;;  %1353 = vmatprep.subr.bf16.mxu0 %v2462_v27 }
  0xa2   :  { %1394 = vmatprep.subr.bf16.mxu1 %v2465_v28 }
  0xa4   :  { %1354 = vmatpush1.bf16.msra.mxu0 %v2460_v29  ;;  %v172_v29 = vsub.s32 3, %v2864_v9 }
  0xa5   :  { %1395 = vmatpush1.bf16.msra.mxu1 %v2463_v30  ;;  %1355 = vmatprep.subr.bf16.mxu0 %v2468_v31  ;;  %v168_v30 = vsub.s32 2, %v2864_v9 }
  0xa6   :  { %1396 = vmatprep.subr.bf16.mxu1 %v2471_v32  ;;  %v173_v31 = vrot.slane %v84_v11, %v172_v29 }
  0xa8   :  { %1356 = vmatpush1.bf16.msra.mxu0 %v2466_v33 }
  0xa9   :  { %1397 = vmatpush1.bf16.msra.mxu1 %v2469_v34  ;;  %1357 = vmatprep.subr.bf16.mxu0 %v2474_v35  ;;  %v169_v34 = vrot.slane %v84_v11, %v168_v30  ;;  %v2554_v11 = vld [vmem:[#allocation4 + $0x168] ss:$28 sps:$4 sm:$0xff]  }
  0xaa   :  { %1398 = vmatprep.subr.bf16.mxu1 %v2477_v37 }
  0xac   :  { %1358 = vmatpush1.bf16.msra.mxu0 %v2472_v38 }
  0xad   :  { %1399 = vmatpush1.bf16.msra.mxu1 %v2475_v39  ;;  %1359 = vmatprep.subr.bf16.mxu0 %v2480_v41 }
  0xae   :  { %1400 = vmatprep.subr.bf16.mxu1 %v2483_v43 }
  0xb0   :  { %1360 = vmatpush1.bf16.msra.mxu0 %v2478_v40 }
  0xb1   :  { %1401 = vmatpush1.bf16.msra.mxu1 %v2481_v42  ;;  %1361 = vmatprep.subr.bf16.mxu0 %v2486_v44 }
  0xb2   :  { %1402 = vmatprep.subr.bf16.mxu1 %v2489_v45 }
  0xb4   :  { %1362 = vmatpush1.bf16.msra.mxu0 %v2484_v46 }
  0xb5   :  { %1403 = vmatpush1.bf16.msra.mxu1 %v2487_v47  ;;  %1363 = vmatprep.subr.bf16.mxu0 %v2492_v48  ;;  %v2520_v47 = vld [vmem:[#allocation4 + $0x10] ss:$28 sps:$4 sm:$0xff]   ;;  %v2524_v48 = vld [vmem:[#allocation4 + $0x18] ss:$28 sps:$4 sm:$0xff]  }
  0xb6   :  { %1404 = vmatprep.subr.bf16.mxu1 %v2495_v49 }
  0xb8   :  { %1364 = vmatpush1.bf16.msra.mxu0 %v2490_v50  ;;  %v2527_v50 = vld [vmem:[#allocation4 + $0x4c] ss:$28 sps:$4 sm:$0xff]  }
  0xb9   :  { %1405 = vmatpush1.bf16.msra.mxu1 %v2493_v51  ;;  %1365 = vmatprep.subr.bf16.mxu0 %v2498_v52  ;;  %v2528_v51 = vld [vmem:[#allocation4 + $0x210] ss:$28 sps:$4 sm:$0xff]   ;;  %v2525_v52 = vld [vmem:[#allocation4 + $0x48] ss:$28 sps:$4 sm:$0xff]  }
  0xba   :  { %1406 = vmatprep.subr.bf16.mxu1 %v2501_v53  ;;  %v2529_v53 = vld [vmem:[#allocation4 + $0x50] ss:$28 sps:$4 sm:$0xff]  }
  0xbc   :  { %1366 = vmatpush1.bf16.msra.mxu0 %v2496_v54  ;;  %v2533_v54 = vld [vmem:[#allocation4 + $0x248] ss:$28 sps:$4 sm:$0xff]  }
  0xbd   :  { %1407 = vmatpush1.bf16.msra.mxu1 %v2499_v55  ;;  %1367 = vmatprep.subr.bf16.mxu0 %v2504_v56  ;;  %v2530_v55 = vld [vmem:[#allocation4 + $0x80] ss:$28 sps:$4 sm:$0xff]   ;;  %v2534_v56 = vld [vmem:[#allocation4 + $0x88] ss:$28 sps:$4 sm:$0xff]  }
  0xbe   :  { %1408 = vmatprep.subr.bf16.mxu1 %v2507_v58  ;;  %v2538_v58 = vld [vmem:[#allocation4 + $0x280] ss:$28 sps:$4 sm:$0xff]  }
  0xc0   :  { %1368 = vmatpush1.bf16.msra.mxu0 %v2502_v57  ;;  %v2537_v57 = vld [vmem:[#allocation4 + $0xbc] ss:$28 sps:$4 sm:$0xff]  }
  0xc1   :  { %1409 = vmatpush1.bf16.msra.mxu1 %v2505_v59  ;;  %1369 = vmatprep.subr.bf16.mxu0 %v2510_v60  ;;  %v2535_v59 = vld [vmem:[#allocation4 + $0xb8] ss:$28 sps:$4 sm:$0xff]   ;;  %v2539_v60 = vld [vmem:[#allocation4 + $0xc0] ss:$28 sps:$4 sm:$0xff]  }
  0xc2   :  { %1410 = vmatprep.subr.bf16.mxu1 %v2513_v61  ;;  %v2542_v61 = vld [vmem:[#allocation4 + $0xf4] ss:$28 sps:$4 sm:$0xff]  }
  0xc4   :  { %1370 = vmatpush1.bf16.msra.mxu0 %v2508_v63  ;;  %v2543_v63 = vld [vmem:[#allocation4 + $0x2b8] ss:$28 sps:$4 sm:$0xff]  }
  0xc5   :  { %1411 = vmatpush1.bf16.msra.mxu1 %v2511_v1  ;;  %1371 = vmatprep.subr.bf16.mxu0 %v2516_v2  ;;  %v2540_v1 = vld [vmem:[#allocation4 + $0xf0] ss:$28 sps:$4 sm:$0xff]  }
  0xc6   :  { %1412 = vmatprep.subr.bf16.mxu1 %v2519_v3  ;;  %v2547_v2 = vld [vmem:[#allocation4 + $0x12c] ss:$28 sps:$4 sm:$0xff]  }
  0xc7   :  { %v2548_v3 = vld [vmem:[#allocation4 + $0x2f0] ss:$28 sps:$4 sm:$0xff]  }
  0xc8   :  { %1372 = vmatpush1.bf16.msra.mxu0 %v2514_v4  ;;  %v2545_v4 = vld [vmem:[#allocation4 + $0x128] ss:$28 sps:$4 sm:$0xff]  }
  0xc9   :  { %1413 = vmatpush1.bf16.msra.mxu1 %v2517_v5  ;;  %1423 = vmatprep.subr.bf16.mxu0 %v2522_v6  ;;  %v2549_v5 = vld [vmem:[#allocation4 + $0x130] ss:$28 sps:$4 sm:$0xff]   ;;  %v2552_v6 = vld [vmem:[#allocation4 + $0x164] ss:$28 sps:$4 sm:$0xff]  }
  0xca   :  { %2221 = vmatprep.subr.bf16.mxu1 %v2523_v7  ;;  %v2553_v7 = vld [vmem:[#allocation4 + $0x328] ss:$28 sps:$4 sm:$0xff]  }
 0x15e   :  { %v532_v14 = vpop.f32.mrb[0].mxu0 }
 0x15f   :  { %v533_v16 = vadd.f32 %v532_v14, %v161_v13  ;;  %v534_v17 = vpop.f32.mrb[1].mxu0  ;;  %v573_v23 = vpop.f32.mrb[0].mxu1  ;;  %v2557_v13 = vld [vmem:[#allocation4 + $0x19c] ss:$28 sps:$4 sm:$0xff]  }
 0x160   :  { %v536_v18 = vpop.f32.mrb[2].mxu0  ;;  %v535_v21 = vadd.f32 %v534_v17, %v165_v15  ;;  %v575_v24 = vpop.f32.mrb[1].mxu1  ;;  %v574_v38 = vadd.f32 %v573_v23, %v169_v34  ;;  %v2558_v14 = vld [vmem:[#allocation4 + $0x360] ss:$28 sps:$4 sm:$0xff]   ;;  %v2555_v15 = vld [vmem:[#allocation4 + $0x198] ss:$28 sps:$4 sm:$0xff]  }
 0x161   :  { %v2062_v19 = vmul.f32 -1.442695, %v533_v16  ;;  %v537_v20 = vpop.f32.mrb[3].mxu0  ;;  %v577_v25 = vpop.f32.mrb[2].mxu1  ;;  %v576_v35 = vadd.f32 %v575_v24, %v173_v31  ;;  %v2559_v16 = vld [vmem:[#allocation4 + $0x1a0] ss:$28 sps:$4 sm:$0xff]  }
 0x162   :  { %v2063_v22 = vmul.f32 -1.442695, %v535_v21  ;;  %v578_v26 = vpop.f32.mrb[3].mxu1  ;;  %v2562_v17 = vld [vmem:[#allocation4 + $0x1d4] ss:$28 sps:$4 sm:$0xff]  }
 0x163   :  { %2624 = vpow2.f32 %v2062_v19  ;;  %v2560_v18 = vld [vmem:[#allocation4 + $0x1d0] ss:$28 sps:$4 sm:$0xff]   ;;  %v2563_v20 = vld [vmem:[#allocation4 + $0x208] ss:$28 sps:$4 sm:$0xff]   ;;  %v2571_v23 = vld [vmem:[#allocation4 + $0x27c] ss:$28 sps:$4 sm:$0xff]  }
 0x164   :  { %2626 = vpow2.f32 %v2063_v22  ;;  %v2565_v19 = vld [vmem:[#allocation4 + $0x20c] ss:$28 sps:$4 sm:$0xff]   ;;  %v2568_v21 = vld [vmem:[#allocation4 + $0x244] ss:$28 sps:$4 sm:$0xff]   ;;  %v2569_v24 = vld [vmem:[#allocation4 + $0x278] ss:$28 sps:$4 sm:$0xff]  }
 0x165   :  { %v2566_v22 = vld [vmem:[#allocation4 + $0x240] ss:$28 sps:$4 sm:$0xff]   ;;  %v2574_v25 = vld [vmem:[#allocation4 + $0x2b4] ss:$28 sps:$4 sm:$0xff]  }
 0x166   :  { %v2572_v26 = vld [vmem:[#allocation4 + $0x2b0] ss:$28 sps:$4 sm:$0xff]   ;;  %v2580_v31 = vld [vmem:[#allocation4 + $0x324] ss:$28 sps:$4 sm:$0xff]   ;;  %v2581_v34 = vld [vmem:[#allocation4 + $0x358] ss:$28 sps:$4 sm:$0xff]  }
 0x16d   :  { %v2625_v27 = vpop.eup %2624 }
 0x16e   :  { %v583_v28 = vadd.f32 1.0, %v2625_v27  ;;  %v2627_v32 = vpop.eup %2626  ;;  %v2577_v27 = vld [vmem:[#allocation4 + $0x2ec] ss:$28 sps:$4 sm:$0xff]  }
 0x16f   :  { %v589_v33 = vadd.f32 1.0, %v2627_v32  ;;  %v2578_v32 = vld [vmem:[#allocation4 + $0x320] ss:$28 sps:$4 sm:$0xff]  }
 0x170   :  { %2628 = vrcp.f32 %v583_v28  ;;  %v2575_v28 = vld [vmem:[#allocation4 + $0x2e8] ss:$28 sps:$4 sm:$0xff]  }
 0x171   :  { %2630 = vrcp.f32 %v589_v33  ;;  %v2583_v33 = vld [vmem:[#allocation4 + $0x35c] ss:$28 sps:$4 sm:$0xff]  }
 0x17a   :  { %v2629_v37 = vpop.eup %2628 }
 0x17b   :  { %v592_v39 = vmul.f32 %v2629_v37, %v576_v35  ;;  %v2631_v41 = vpop.eup %2630  ;;  %v2584_v35 = vld [vmem:[#allocation6] sm:$0xff]   ;;  %v2748_v37 = vmov 0.0  }
 0x17c   :  { %v595_v42 = vsub.f32 1.0, %v2631_v41  ;;  %v597_v45 = vmul.f32 %v2631_v41, %v2846_v36  ;;  %v2532_v36 = vld [vmem:[#allocation4 + $0x84] ss:$28 sps:$4 sm:$0xff]  }
 0x17d   :  { %v593_v40 = vadd.f32 %v592_v39, %v574_v38  ;;  %v2585_v38 = vld [vmem:[#allocation6 + $0x8] sm:$0xff]   ;;  %v2586_v39 = vld [vmem:[#allocation6 + $0x10] sm:$0xff]   ;;  %v2588_v41 = vld [vmem:[#allocation6 + $0x20] sm:$0xff]  }
 0x17f   :  { %2632 = vtanh.f32 %v593_v40  ;;  %v2587_v40 = vld [vmem:[#allocation6 + $0x18] sm:$0xff]  }
 0x189   :  { %v2633_v43 = vpop.eup %2632 }
 0x18a   :  { %v596_v44 = vmul.f32 %v2633_v43, %v595_v42  ;;  %v2589_v42 = vld [vmem:[#allocation7 + $0x40] sm:$0xff]   ;;  %v2590_v43 = vld [vmem:[#allocation6 + $0x28] sm:$0xff]  }
 0x18c   :  { %v598_v46 = vadd.f32 %v597_v45, %v596_v44  ;;  %v2591_v44 = vld [vmem:[#allocation7] sm:$0xff]   ;;  %v2592_v45 = vld [vmem:[#allocation7 + $0x48] sm:$0xff]  }
 0x18e   :  { %v2882_v49 = vpack.c.bf16 %v598_v46, %v598_v46  ;;  %1523 = vst [vmem:[%s2936_s7] sm:$0xff] %v598_v46  ;;  %v2593_v46 = vld [vmem:[#allocation6 + $0x30] sm:$0xff]  }
 0x190   :  { %1374 = vmatmul.mubr.bf16.vlgmr.msra.gmra.mrb[4].mxu0 %v2882_v49  ;;  %1415 = vmatmul.mubr.bf16.vlgmr.msra.gmra.mrb[4].mxu1 %v2882_v49 }
 0x191   :  { %1424 = vmatpush1.bf16.msra.mxu0 %v2520_v47  ;;  %2222 = vmatpush3.bf16.msra.mxu1 %v2524_v48  ;;  %v2594_v47 = vld [vmem:[#allocation7 + $0x8] sm:$0xff]   ;;  %v2595_v48 = vld [vmem:[#allocation7 + $0x50] sm:$0xff]  }
 0x192   :  { %1425 = vmatprep.subr.bf16.mxu0 %v2527_v50  ;;  %2223 = vmatprep.subr.bf16.mxu1 %v2528_v51  ;;  %v2597_v50 = vld [vmem:[#allocation7 + $0x10] sm:$0xff]   ;;  %v2598_v51 = vld [vmem:[#allocation7 + $0x58] sm:$0xff]  }
 0x193   :  { %1496 = vmatprep.mubr.bf16.mxu1 %v2860_v0  ;;  %1455 = vmatprep.mubr.bf16.mxu0 %v2860_v0  ;;  %v2544_v0 = vld [vmem:[#allocation4 + $0xf8] ss:$28 sps:$4 sm:$0xff]  }
 0x195   :  { %1426 = vmatpush1.bf16.msra.mxu0 %v2525_v52  ;;  %2224 = vmatpush3.bf16.msra.mxu1 %v2529_v53  ;;  %v2599_v52 = vld [vmem:[#allocation7 + $0x18] sm:$0xff]   ;;  %v2600_v53 = vld [vmem:[#allocation7 + $0x60] sm:$0xff]  }
 0x196   :  { %1427 = vmatprep.subr.bf16.mxu0 %v2532_v36  ;;  %2225 = vmatprep.subr.bf16.mxu1 %v2533_v54  ;;  %v2601_v36 = vld [vmem:[#allocation7 + $0x20] sm:$0xff]   ;;  %v2602_v54 = vld [vmem:[#allocation7 + $0x68] sm:$0xff]  }
 0x199   :  { %1428 = vmatpush1.bf16.msra.mxu0 %v2530_v55  ;;  %2226 = vmatpush3.bf16.msra.mxu1 %v2534_v56  ;;  %v2603_v55 = vld [vmem:[#allocation7 + $0x28] sm:$0xff]   ;;  %v2604_v56 = vld [vmem:[#allocation7 + $0x70] sm:$0xff]  }
 0x19a   :  { %1429 = vmatprep.subr.bf16.mxu0 %v2537_v57  ;;  %2227 = vmatprep.subr.bf16.mxu1 %v2538_v58  ;;  %v2605_v57 = vld [vmem:[#allocation7 + $0x30] sm:$0xff]   ;;  %v2606_v58 = vld [vmem:[#allocation7 + $0x78] sm:$0xff]  }
 0x19d   :  { %1430 = vmatpush1.bf16.msra.mxu0 %v2535_v59  ;;  %2228 = vmatpush3.bf16.msra.mxu1 %v2539_v60  ;;  %v2607_v59 = vld [vmem:[#allocation7 + $0x38] sm:$0xff]   ;;  %v2608_v60 = vld [vmem:[#allocation7 + $0xc0] sm:$0xff]  }
 0x19e   :  { %1431 = vmatprep.subr.bf16.mxu0 %v2542_v61  ;;  %2229 = vmatprep.subr.bf16.mxu1 %v2543_v63  ;;  %v2896_v61 = vld [vmem:[%s2935_s6 + $0x4] sm:$0xff] }
 0x19f   :  { %v733_v63 = vrot.slane %v2896_v61, %v160_v10 }
 0x1a1   :  { %1432 = vmatpush1.bf16.msra.mxu0 %v2540_v1  ;;  %2230 = vmatpush3.bf16.msra.mxu1 %v2544_v0 }
 0x1a2   :  { %1433 = vmatprep.subr.bf16.mxu0 %v2547_v2  ;;  %2231 = vmatprep.subr.bf16.mxu1 %v2548_v3  ;;  %v737_v2 = vrot.slane %v2896_v61, %v164_v12  ;;  %v745_v12 = vrot.slane %v2896_v61, %v172_v29 }
 0x1a5   :  { %1434 = vmatpush1.bf16.msra.mxu0 %v2545_v4  ;;  %2232 = vmatpush3.bf16.msra.mxu1 %v2549_v5 }
 0x1a6   :  { %1435 = vmatprep.subr.bf16.mxu0 %v2552_v6  ;;  %2233 = vmatprep.subr.bf16.mxu1 %v2553_v7 }
 0x1a9   :  { %1436 = vmatpush1.bf16.msra.mxu0 %v2550_v8  ;;  %2234 = vmatpush3.bf16.msra.mxu1 %v2554_v11 }
 0x1aa   :  { %1437 = vmatprep.subr.bf16.mxu0 %v2557_v13  ;;  %2235 = vmatprep.subr.bf16.mxu1 %v2558_v14 }
 0x1ad   :  { %1438 = vmatpush1.bf16.msra.mxu0 %v2555_v15  ;;  %2236 = vmatpush3.bf16.msra.mxu1 %v2559_v16 }
 0x1ae   :  { %1439 = vmatprep.subr.bf16.mxu0 %v2562_v17  ;;  %2296 = vmatprep.subr.bf16.mxu1 %v2748_v37 }
 0x1b0   :  { %1497 = vmatmul.mubr.bf16.vlgmr.msra.gmra.mrb[8].mxu1 %v2882_v49 }
 0x1b1   :  { %1440 = vmatpush1.bf16.msra.mxu0 %v2560_v18  ;;  %2297 = vmatpush3.bf16.msra.mxu1 %v2584_v35  ;;  %v741_v18 = vrot.slane %v2896_v61, %v168_v30 }
 0x1b2   :  { %1441 = vmatprep.subr.bf16.mxu0 %v2565_v19  ;;  %2298 = vmatprep.subr.bf16.mxu1 %v2748_v37 }
 0x1b3   :  { %2312 = vmatprep.mubr.msk.bf16.mxu1 %vm2749_vm0, %v2748_v37 }
 0x1b5   :  { %1442 = vmatpush1.bf16.msra.mxu0 %v2563_v20  ;;  %2299 = vmatpush3.bf16.msra.mxu1 %v2585_v38 }
 0x1b6   :  { %1443 = vmatprep.subr.bf16.mxu0 %v2568_v21  ;;  %2300 = vmatprep.subr.bf16.mxu1 %v2748_v37 }
 0x1b9   :  { %1444 = vmatpush1.bf16.msra.mxu0 %v2566_v22  ;;  %2301 = vmatpush3.bf16.msra.mxu1 %v2586_v39 }
 0x1ba   :  { %1445 = vmatprep.subr.bf16.mxu0 %v2571_v23  ;;  %2302 = vmatprep.subr.bf16.mxu1 %v2748_v37 }
 0x1bd   :  { %1446 = vmatpush1.bf16.msra.mxu0 %v2569_v24  ;;  %2303 = vmatpush3.bf16.msra.mxu1 %v2587_v40 }
 0x1be   :  { %1447 = vmatprep.subr.bf16.mxu0 %v2574_v25  ;;  %2304 = vmatprep.subr.bf16.mxu1 %v2748_v37 }
 0x1c1   :  { %1448 = vmatpush1.bf16.msra.mxu0 %v2572_v26  ;;  %2305 = vmatpush3.bf16.msra.mxu1 %v2588_v41  ;;  %v756_v26 = vsub.s32 6, %v2864_v9  ;;  %v2609_v41 = vld [vmem:[#allocation7 + $0x80] sm:$0xff]  }
 0x1c2   :  { %1449 = vmatprep.subr.bf16.mxu0 %v2577_v27  ;;  %2306 = vmatprep.subr.bf16.mxu1 %v2748_v37 }
 0x1c3   :  { %v757_v29 = vrot.slane %v2896_v61, %v756_v26 }
 0x1c5   :  { %1450 = vmatpush1.bf16.msra.mxu0 %v2575_v28  ;;  %2307 = vmatpush3.bf16.msra.mxu1 %v2590_v43  ;;  %v2610_v43 = vld [vmem:[#allocation7 + $0xc8] sm:$0xff]  }
 0x1c6   :  { %1451 = vmatprep.subr.bf16.mxu0 %v2580_v31  ;;  %2308 = vmatprep.subr.bf16.mxu1 %v2748_v37 }
 0x1c9   :  { %1452 = vmatpush1.bf16.msra.mxu0 %v2578_v32  ;;  %2309 = vmatpush3.bf16.msra.mxu1 %v2593_v46  ;;  %v2612_v46 = vld [vmem:[#allocation7 + $0xd0] sm:$0xff]  }
 0x1ca   :  { %1453 = vmatprep.subr.bf16.mxu0 %v2583_v33  ;;  %2310 = vmatprep.subr.bf16.mxu1 %v2748_v37 }
 0x1cd   :  { %1454 = vmatpush1.bf16.msra.mxu0 %v2581_v34 }
 0x1ce   :  { %2252 = vmatprep.subr.bf16.mxu0 %v2589_v42 }
 0x1d0   :  { %1456 = vmatmul.mubr.bf16.vlgmr.msra.gmra.mrb[8].mxu0 %v2882_v49  ;;  %v2596_v49 = vld [vmem:[#allocation6 + $0x38] sm:$0xff]  }
 0x1d1   :  { %2253 = vmatpush3.bf16.msra.mxu0 %v2591_v44  ;;  %2311 = vmatpush3.bf16.msra.mxu1 %v2596_v49  ;;  %v752_v49 = vsub.s32 5, %v2864_v9 }
 0x1d2   :  { %2254 = vmatprep.subr.bf16.mxu0 %v2592_v45  ;;  %2274 = vmatprep.subr.bf16.mxu1 %v2608_v60  ;;  %v2611_v45 = vld [vmem:[#allocation7 + $0x88] sm:$0xff]  }
 0x1d5   :  { %2255 = vmatpush3.bf16.msra.mxu0 %v2594_v47  ;;  %v2613_v47 = vld [vmem:[#allocation7 + $0x90] sm:$0xff]  }
 0x1d6   :  { %2256 = vmatprep.subr.bf16.mxu0 %v2595_v48  ;;  %v748_v48 = vsub.s32 4, %v2864_v9  ;;  %v2619_v9 = vld [vmem:[#allocation7 + $0xa8] sm:$0xff]  }
 0x1d9   :  { %2257 = vmatpush3.bf16.msra.mxu0 %v2597_v50  ;;  %v2615_v50 = vld [vmem:[#allocation7 + $0x98] sm:$0xff]  }
 0x1da   :  { %2258 = vmatprep.subr.bf16.mxu0 %v2598_v51  ;;  %v2616_v51 = vld [vmem:[#allocation7 + $0xe0] sm:$0xff]  }
 0x1dd   :  { %2259 = vmatpush3.bf16.msra.mxu0 %v2599_v52  ;;  %v749_v52 = vrot.slane %v2896_v61, %v748_v48 }
 0x1de   :  { %2260 = vmatprep.subr.bf16.mxu0 %v2600_v53  ;;  %v753_v53 = vrot.slane %v2896_v61, %v752_v49  ;;  %v2621_v61 = vld [vmem:[#allocation7 + $0xb0] sm:$0xff]  }
 0x1e1   :  { %2261 = vmatpush3.bf16.msra.mxu0 %v2601_v36  ;;  %v2617_v36 = vld [vmem:[#allocation7 + $0xa0] sm:$0xff]  }
 0x1e2   :  { %2262 = vmatprep.subr.bf16.mxu0 %v2602_v54 }
 0x1e5   :  { %2263 = vmatpush3.bf16.msra.mxu0 %v2603_v55  ;;  %v2618_v55 = vld [vmem:[#allocation7 + $0xe8] sm:$0xff]  }
 0x1e6   :  { %2264 = vmatprep.subr.bf16.mxu0 %v2604_v56 }
 0x1e9   :  { %2265 = vmatpush3.bf16.msra.mxu0 %v2605_v57 }
 0x1ea   :  { %2266 = vmatprep.subr.bf16.mxu0 %v2606_v58 }
 0x1ed   :  { %2267 = vmatpush3.bf16.msra.mxu0 %v2607_v59 }
 0x263   :  { %v1375_v1 = vpop.f32.mrb[4].mxu0  ;;  %v1416_v0 = vpop.f32.mrb[4].mxu1 }
 0x264   :  { %v1376_v3 = vadd.f32 %v1375_v1, %v733_v63  ;;  %v1377_v4 = vpop.f32.mrb[5].mxu0  ;;  %v1418_v5 = vpop.f32.mrb[5].mxu1  ;;  %v1417_v22 = vadd.f32 %v1416_v0, %v741_v18  ;;  %v2620_v1 = vld [vmem:[#allocation7 + $0xf0] sm:$0xff]   ;;  %v2188_v18 = vld [vmem:[%s2935_s6 + $0xc] ss:$0 sm:$0xff] }
 0x265   :  { %v1379_v6 = vpop.f32.mrb[6].mxu0  ;;  %v1420_v7 = vpop.f32.mrb[6].mxu1  ;;  %v1378_v14 = vadd.f32 %v1377_v4, %v737_v2  ;;  %v1419_v20 = vadd.f32 %v1418_v5, %v745_v12  ;;  %v2622_v2 = vld [vmem:[#allocation7 + $0xf8] sm:$0xff]   ;;  %v2179_v4 = vld [vmem:[%s2935_s6 + $0xb] ss:$0 sm:$0xff] }
 0x266   :  { %v2176_v8 = vmul.f32 -1.442695, %v1376_v3  ;;  %v1380_v11 = vpop.f32.mrb[7].mxu0  ;;  %v1421_v13 = vpop.f32.mrb[7].mxu1  ;;  %v2623_v3 = vld [vmem:[#allocation7 + $0xb8] sm:$0xff]  }
 0x267   :  { %v2177_v15 = vmul.f32 -1.442695, %v1378_v14 }
 0x268   :  { %2634 = vpow2.f32 %v2176_v8 }
 0x269   :  { %2636 = vpow2.f32 %v2177_v15 }
 0x272   :  { %v2635_v16 = vpop.eup %2634 }
 0x273   :  { %v1507_v10 = vadd.f32 1.0, %v2635_v16  ;;  %v2637_v17 = vpop.eup %2636 }
 0x274   :  { %v1513_v19 = vadd.f32 1.0, %v2637_v17 }
 0x275   :  { %2638 = vrcp.f32 %v1507_v10 }
 0x276   :  { %2640 = vrcp.f32 %v1513_v19 }
 0x27f   :  { %v2639_v21 = vpop.eup %2638 }
 0x280   :  { %v1516_v23 = vmul.f32 %v2639_v21, %v1419_v20  ;;  %v2641_v33 = vpop.eup %2640 }
 0x281   :  { %v1519_v30 = vsub.f32 1.0, %v2641_v33  ;;  %v1521_v38 = vmul.f32 %v2641_v33, %v2856_v62  ;;  %v2614_v62 = vld [vmem:[#allocation7 + $0xd8] sm:$0xff]  }
 0x282   :  { %v1517_v24 = vadd.f32 %v1516_v23, %v1417_v22 }
 0x283   :  { %v2237_v25 = vpop.f32.mrb[8].mxu1 }
 0x284   :  { %2642 = vtanh.f32 %v1517_v24  ;;  %v2238_v27 = vpop.f32.mrb[9].mxu1 }
 0x285   :  { %v2239_v28 = vadd.f32 %v2238_v27, %v2237_v25  ;;  %v2240_v31 = vpop.f32.mrb[10].mxu1 }
 0x286   :  { %v2241_v32 = vpop.f32.mrb[11].mxu1 }
 0x287   :  { %v1499_v34 = vadd.f32 %v2239_v28, %v757_v29 }
 0x289   :  { %v1526_v39 = vmax.f32 %v1499_v34, 0.0 }
 0x28b   :  { %v1642_v44 = vpack.c.bf16 %v1526_v39, %v1526_v39 }
 0x28e   :  { %v2643_v35 = vpop.eup %2642 }
 0x28f   :  { %v1520_v37 = vmul.f32 %v2643_v35, %v1519_v30 }
 0x291   :  { %v1522_v40 = vadd.f32 %v1521_v38, %v1520_v37 }
 0x293   :  { %2178 = vst [vmem:[%s2936_s7 + $0x8] sm:$0xff] %v1522_v40  ;;  %v1527_v42 = vpack.c.bf16 %v1522_v40, %v1522_v40 }
 0x295   :  { %2313 = vmatmul.mubr.bf16.vlgmr.msra.gmra.mrb[12].mxu1 %v1527_v42 }
 0x296   :  { %1977 = vmatprep.mubr.bf16.mxu1 %v1642_v44  ;;  %2275 = vmatpush3.bf16.msra.mxu1 %v2609_v41 }
 0x297   :  { %2276 = vmatprep.subr.bf16.mxu1 %v2610_v43 }
 0x29a   :  { %2277 = vmatpush3.bf16.msra.mxu1 %v2611_v45 }
 0x29b   :  { %2278 = vmatprep.subr.bf16.mxu1 %v2612_v46 }
 0x29e   :  { %2279 = vmatpush3.bf16.msra.mxu1 %v2613_v47 }
 0x29f   :  { %2280 = vmatprep.subr.bf16.mxu1 %v2614_v62 }
 0x2a2   :  { %2281 = vmatpush3.bf16.msra.mxu1 %v2615_v50 }
 0x2a3   :  { %v1457_v54 = vpop.f32.mrb[8].mxu0  ;;  %2282 = vmatprep.subr.bf16.mxu1 %v2616_v51 }
 0x2a4   :  { %v1458_v56 = vadd.f32 %v1457_v54, %v749_v52  ;;  %v1459_v57 = vpop.f32.mrb[9].mxu0 }
 0x2a5   :  { %v1460_v58 = vadd.f32 %v1459_v57, %v753_v53  ;;  %v1461_v59 = vpop.f32.mrb[10].mxu0 }
 0x2a6   :  { %v1462_v60 = vpop.f32.mrb[11].mxu0  ;;  %2283 = vmatpush3.bf16.msra.mxu1 %v2617_v36  ;;  %v1639_v0 = vpack.c.bf16 %v1458_v56, %v1458_v56 }
 0x2a7   :  { %v1640_v63 = vpack.c.bf16 %v1460_v58, %v1460_v58  ;;  %2284 = vmatprep.subr.bf16.mxu1 %v2618_v55 }
 0x2a9   :  { %1937 = vmatprep.mubr.bf16.mxu0 %v1640_v63 }
 0x2aa   :  { %1938 = vmatmul.mubr.bf16.vlgmr.msra.gmra.mrb[12].mxu0 %v1639_v0  ;;  %2285 = vmatpush3.bf16.msra.mxu1 %v2619_v9 }
 0x2ab   :  { %2286 = vmatprep.subr.bf16.mxu1 %v2620_v1 }
 0x2ae   :  { %2287 = vmatpush3.bf16.msra.mxu1 %v2621_v61 }
 0x2af   :  { %2288 = vmatprep.subr.bf16.mxu1 %v2622_v2 }
 0x2b2   :  { %2289 = vmatpush3.bf16.msra.mxu1 %v2623_v3 }
 0x368   :  { %v1632_v5 = vpop.f32.mrb[12].mxu1 }
 0x369   :  { %v1633_v6 = vadd.f32 %v2179_v4, %v1632_v5  ;;  %v2314_v7 = vpop.f32.mrb[13].mxu1 }
 0x36a   :  { %v1635_v8 = vpop.f32.mrb[14].mxu1 }
 0x36b   :  { %v1638_v11 = vmax.f32 %v1633_v6, 0.0  ;;  %v2315_v13 = vpop.f32.mrb[15].mxu1 }
 0x36d   :  { %v1641_v14 = vpack.c.bf16 %v1638_v11, %v1638_v11 }
 0x36f   :  { %1978 = vmatmul.mubr.bf16.vlgmr.msra.gmra.mrb[16].mxu1 %v1641_v14 }
 0x37d   :  { %v2268_v15 = vpop.f32.mrb[12].mxu0 }
 0x37e   :  { %v2269_v16 = vpop.f32.mrb[13].mxu0 }
 0x37f   :  { %v2270_v10 = vadd.f32 %v2269_v16, %v2268_v15  ;;  %v2271_v17 = vpop.f32.mrb[14].mxu0 }
 0x380   :  { %v2272_v12 = vpop.f32.mrb[15].mxu0 }
 0x381   :  { %v1940_v21 = vadd.f32 %v2270_v10, %v2188_v18 }
 0x442   :  { %v2290_v19 = vpop.f32.mrb[16].mxu1 }
 0x443   :  { %v2291_v20 = vpop.f32.mrb[17].mxu1 }
 0x444   :  { %v2292_v22 = vadd.f32 %v2291_v20, %v2290_v19  ;;  %v2293_v23 = vpop.f32.mrb[18].mxu1 }
 0x445   :  { %v2294_v24 = vpop.f32.mrb[19].mxu1 }
 0x446   :  { %v1980_v25 = vadd.f32 %v2292_v22, %v1940_v21 }
 0x448   :  { %1985 = vst [vmem:[%s2937_s8] sm:$0xff] %v1980_v25 }
 0x449   :  { %1994 = vsyncpa [#allocation3], 1 }
 0x44a   :  { %1995 = vsyncpa [#allocation5], 1 }
 0x44b   :  { %1996 = vsyncpa [#allocation8], 1 }

</bundles_post_ra>
